<compile_context>
chip_gen: v7x
topology: tpu7x:2x2x1
jax: 0.10.0
libtpu: 0.0.40
codegen_flags: <defaults>
</compile_context>

<pallas_src>
import functools

import jax
import jax.numpy as jnp
from jax import lax
from jax.experimental import pallas as pl
from jax.experimental.pallas import tpu as pltpu


# --------------------------------------------------------------------------
# Kernel bodies
# --------------------------------------------------------------------------
def _per_sample_focal(pred_t_ref, tgt_ref, *, gamma, num_classes):
    """Per-sample focal loss for one (C, block_n) logits tile -> (1, block_n)."""
    # Per-class rows, cast to f32 in-kernel (VPU cast is free filler).
    rows = [
        pred_t_ref[pl.ds(c, 1), :].astype(jnp.float32)      # (1, block_n)
        for c in range(num_classes)
    ]

    # Numerically stable log-softmax, unrolled over the tiny class axis
    # (pure per-lane VPU ops; no sublane/XLU reductions).
    m = rows[0]
    for r in rows[1:]:
        m = jnp.maximum(m, r)
    denom = jnp.exp(rows[0] - m)
    for r in rows[1:]:
        denom = denom + jnp.exp(r - m)
    lse = jnp.log(denom) + m                                  # (1, block_n)

    # Gather pred[i, target_i] via an unrolled select chain (== torch.gather).
    tgt = tgt_ref[...]                                        # (1, block_n) int
    sel = rows[num_classes - 1]
    for c in range(num_classes - 2, -1, -1):
        sel = jnp.where(tgt == c, rows[c], sel)

    logpt = sel - lse
    pt = jnp.exp(logpt)
    ce = -logpt
    one_minus_pt = 1.0 - pt
    if gamma == 2:
        w = one_minus_pt * one_minus_pt                       # stay off EUP pow
    elif isinstance(gamma, int):
        w = one_minus_pt ** gamma                             # integer_pow
    else:
        w = one_minus_pt ** jnp.float32(gamma)
    return w * ce                                             # (1, block_n)


def _focal_kernel_per_sample(pred_t_ref, tgt_ref, loss_ref, *, gamma,
                             num_classes):
    # reduction == 'none': write the lane-dense per-sample loss.
    fl = _per_sample_focal(pred_t_ref, tgt_ref, gamma=gamma,
                           num_classes=num_classes)
    loss_ref[...] = fl.astype(loss_ref.dtype)


def _focal_kernel_block_sum(pred_t_ref, tgt_ref, psum_ref, *, gamma,
                            num_classes, n_valid, block_n):
    # reduction == 'mean'/'sum': emit one partial sum per grid step so the
    # grid axis stays "parallel" (no cross-step accumulator).
    fl = _per_sample_focal(pred_t_ref, tgt_ref, gamma=gamma,
                           num_classes=num_classes)           # (1, block_n)
    # Mask the ragged tail of the final block (padding lanes hold garbage).
    start = pl.program_id(0) * block_n
    lane = lax.broadcasted_iota(jnp.int32, fl.shape, 1) + start
    fl = jnp.where(lane < n_valid, fl, 0.0)
    s = jnp.sum(fl, axis=1, keepdims=True)                    # (1, 1)
    psum_ref[...] = jnp.broadcast_to(s, psum_ref.shape).astype(psum_ref.dtype)


# --------------------------------------------------------------------------
# Wrapper
# --------------------------------------------------------------------------
def _pick_block_n(n, *, max_block=64 * 1024, min_steps=4):
    """Largest lane-multiple block <= max_block that still leaves >= min_steps
    grid steps (so v7x's two TensorCores both get work) when n allows it."""
    lanes = 128
    n_up = -(-n // lanes) * lanes
    per_step = -(-n_up // min_steps)
    per_step = -(-per_step // lanes) * lanes
    return int(max(lanes, min(max_block, per_step, n_up)))


def multiclass_focal_loss(pred, target, *, alpha=None, gamma=2,
                          reduction="mean", block_n=None):
    """pred: (N, C) float logits; target: (N,) integer class ids.

    Matches MultiClassFocalLossWithAlpha.forward (alpha is unused there,
    so it is unused here too).
    """
    del alpha  # stored-but-unused in the reference module's forward()
    N, C = pred.shape
    if block_n is None:
        block_n = _pick_block_n(N)
    else:
        block_n = max(128, (int(block_n) // 128) * 128)
    num_blocks = -(-N // block_n)

    # Wrapper-side layout plumbing: classes -> sublanes, samples -> lanes.
    # Native dtypes (no cast), no padding; target reshape is metadata-only.
    # TODO(synk): accept (C, N)-major logits upstream to drop this transpose.
    pred_t = jnp.transpose(pred, (1, 0))          # (C, N)
    tgt2d = target.reshape(1, -1)                 # (1, N), caller's int dtype

    in_specs = [
        pl.BlockSpec((C, block_n), lambda i: (0, i)),   # logits tile
        pl.BlockSpec((1, block_n), lambda i: (0, i)),   # targets tile
    ]
    cparams = pltpu.CompilerParams(dimension_semantics=("parallel",))

    if reduction in ("mean", "sum"):
        partials = pl.pallas_call(
            functools.partial(_focal_kernel_block_sum, gamma=gamma,
                              num_classes=C, n_valid=N, block_n=block_n),
            out_shape=jax.ShapeDtypeStruct((num_blocks, 1, 128), jnp.float32),
            grid_spec=pltpu.PrefetchScalarGridSpec(
                num_scalar_prefetch=0,
                grid=(num_blocks,),
                in_specs=in_specs,
                out_specs=pl.BlockSpec((1, 1, 128), lambda i: (i, 0, 0)),
            ),
            compiler_params=cparams,
        )(pred_t, tgt2d)
        total = jnp.sum(partials[:, 0, 0])
        if reduction == "mean":
            return total / jnp.float32(N)
        return total

    # reduction == 'none': per-sample loss, lane-dense output.
    loss = pl.pallas_call(
        functools.partial(_focal_kernel_per_sample, gamma=gamma,
                          num_classes=C),
        out_shape=jax.ShapeDtypeStruct((1, N), jnp.float32),
        grid_spec=pltpu.PrefetchScalarGridSpec(
            num_scalar_prefetch=0,
            grid=(num_blocks,),
            in_specs=in_specs,
            out_specs=pl.BlockSpec((1, block_n), lambda i: (0, i)),
        ),
        compiler_params=cparams,
    )(pred_t, tgt2d)
    return loss[0]


# --------------------------------------------------------------------------
# Self-test
# --------------------------------------------------------------------------
if __name__ == "__main__":
    num_classes = 3        # matches default alpha=[1, 1, 1]

    def ref_focal(pred, target, gamma=2, reduction="mean"):
        log_sm = jax.nn.log_softmax(pred.astype(jnp.float32), axis=1)
        logpt = jnp.take_along_axis(
            log_sm, target.astype(jnp.int32)[:, None], axis=1)[:, 0]
        fl = (1.0 - jnp.exp(logpt)) ** gamma * (-logpt)
        if reduction == "mean":
            return jnp.mean(fl)
        if reduction == "sum":
            return jnp.sum(fl)
        return fl

    key = jax.random.PRNGKey(0)
    cases = [(256, "mean"), (200, "sum"), (256, "none")]   # 200 -> ragged tail
    for n_samples, reduction in cases:
        k_pred, k_tgt, key = jax.random.split(key, 3)
        pred = jax.random.normal(k_pred, (n_samples, num_classes),
                                 dtype=jnp.float32)
        target = jax.random.randint(k_tgt, (n_samples,), 0, num_classes,
                                    dtype=jnp.int32)

        out = multiclass_focal_loss(pred, target, gamma=2, reduction=reduction)
        out = jax.block_until_ready(out)
        ref = ref_focal(pred, target, gamma=2, reduction=reduction)

        assert out.shape == ref.shape, (reduction, out.shape, ref.shape)
        assert jnp.allclose(out, ref, atol=1e-5, rtol=1e-5), \
            (reduction, out, ref)

    print("KERNEL_OK")
</pallas_src>

<mosaic_0001>
module attributes {stable_mosaic.version = 11 : i64} {
  func.func @_focal_kernel_block_sum(%arg0: i32, %arg1: memref<3x128xf32, #tpu.memory_space<vmem>>, %arg2: memref<1x128xi32, #tpu.memory_space<vmem>>, %arg3: memref<1x1x128xf32, #tpu.memory_space<vmem>>) attributes {dimension_semantics = [#tpu.dimension_semantics<parallel>], iteration_bounds = array<i64: 2>, scalar_prefetch = 0 : i64, scratch_operands = 0 : i64, tpu.core_type = #tpu.core_type<tc>, window_params = [{transform_indices = @transform_0, window_bounds = array<i64: 3, 128>}, {transform_indices = @transform_1, window_bounds = array<i64: 1, 128>}, {transform_indices = @transform_2, window_bounds = array<i64: 1, 1, 128>}]} {
    %c0 = arith.constant 0 : index
    %c0_0 = arith.constant 0 : index
    %0 = vector.load %arg1[%c0, %c0_0] : memref<3x128xf32, #tpu.memory_space<vmem>>, vector<1x128xf32>
    %c1 = arith.constant 1 : index
    %c0_1 = arith.constant 0 : index
    %1 = vector.load %arg1[%c1, %c0_1] : memref<3x128xf32, #tpu.memory_space<vmem>>, vector<1x128xf32>
    %c2 = arith.constant 2 : index
    %c0_2 = arith.constant 0 : index
    %2 = vector.load %arg1[%c2, %c0_2] : memref<3x128xf32, #tpu.memory_space<vmem>>, vector<1x128xf32>
    %3 = arith.maximumf %0, %1 : vector<1x128xf32>
    %4 = arith.maximumf %3, %2 : vector<1x128xf32>
    %5 = arith.subf %0, %4 : vector<1x128xf32>
    %6 = math.exp %5 : vector<1x128xf32>
    %7 = arith.subf %1, %4 : vector<1x128xf32>
    %8 = math.exp %7 : vector<1x128xf32>
    %9 = arith.addf %6, %8 : vector<1x128xf32>
    %10 = arith.subf %2, %4 : vector<1x128xf32>
    %11 = math.exp %10 : vector<1x128xf32>
    %12 = arith.addf %9, %11 : vector<1x128xf32>
    %13 = math.log %12 : vector<1x128xf32>
    %14 = arith.addf %13, %4 : vector<1x128xf32>
    %c0_3 = arith.constant 0 : index
    %c0_4 = arith.constant 0 : index
    %15 = vector.load %arg2[%c0_3, %c0_4] : memref<1x128xi32, #tpu.memory_space<vmem>>, vector<1x128xi32>
    %c1_i32 = arith.constant 1 : i32
    %16 = vector.broadcast %c1_i32 : i32 to vector<1x128xi32>
    %17 = arith.cmpi eq, %15, %16 : vector<1x128xi32>
    %18 = arith.select %17, %1, %2 : vector<1x128xi1>, vector<1x128xf32>
    %c0_i32 = arith.constant 0 : i32
    %19 = vector.broadcast %c0_i32 : i32 to vector<1x128xi32>
    %20 = arith.cmpi eq, %15, %19 : vector<1x128xi32>
    %21 = arith.select %20, %0, %18 : vector<1x128xi1>, vector<1x128xf32>
    %22 = arith.subf %21, %14 : vector<1x128xf32>
    %23 = math.exp %22 : vector<1x128xf32>
    %cst = arith.constant 0.000000e+00 : f32
    %24 = vector.broadcast %cst : f32 to vector<1x128xf32>
    %25 = arith.subf %24, %22 : vector<1x128xf32>
    %cst_5 = arith.constant 1.000000e+00 : f32
    %26 = vector.broadcast %cst_5 : f32 to vector<1x128xf32>
    %27 = arith.subf %26, %23 : vector<1x128xf32>
    %28 = arith.mulf %27, %27 : vector<1x128xf32>
    %29 = arith.mulf %28, %25 : vector<1x128xf32>
    %c128_i32 = arith.constant 128 : i32
    %30 = arith.muli %arg0, %c128_i32 : i32
    %31 = tpu.iota {dimensions = array<i32: 1>} : vector<1x128xi32>
    %32 = vector.broadcast %30 : i32 to vector<1x128xi32>
    %33 = arith.addi %31, %32 : vector<1x128xi32>
    %c256_i32 = arith.constant 256 : i32
    %34 = vector.broadcast %c256_i32 : i32 to vector<1x128xi32>
    %35 = arith.cmpi slt, %33, %34 : vector<1x128xi32>
    %cst_6 = arith.constant 0.000000e+00 : f32
    %36 = vector.broadcast %cst_6 : f32 to vector<1x128xf32>
    %37 = arith.select %35, %29, %36 : vector<1x128xi1>, vector<1x128xf32>
    %cst_7 = arith.constant dense<0.000000e+00> : vector<1xf32>
    %38 = vector.multi_reduction <add>, %37, %cst_7 [1] : vector<1x128xf32> to vector<1xf32>
    %39 = vector.shape_cast %38 : vector<1xf32> to vector<1x1xf32>
    %40 = vector.shape_cast %39 : vector<1x1xf32> to vector<1x1x1xf32>
    %41 = vector.broadcast %40 : vector<1x1x1xf32> to vector<1x1x128xf32>
    %c0_8 = arith.constant 0 : index
    %c0_9 = arith.constant 0 : index
    %c0_10 = arith.constant 0 : index
    %42 = vector.load %arg3[%c0_8, %c0_9, %c0_10] : memref<1x1x128xf32, #tpu.memory_space<vmem>>, vector<1x1x128xf32>
    tpu.vector_store %arg3[%c0_8, %c0_9, %c0_10], %41 {strides = array<i32>} : memref<1x1x128xf32, #tpu.memory_space<vmem>>, vector<1x1x128xf32>,
    return
  }
  func.func @transform_0(%arg0: i32) -> (i32, i32) {
    %c0_i32 = arith.constant 0 : i32
    %c0_i32_0 = arith.constant 0 : i32
    return %c0_i32, %arg0 : i32, i32
  }
  func.func @transform_1(%arg0: i32) -> (i32, i32) {
    %c0_i32 = arith.constant 0 : i32
    %c0_i32_0 = arith.constant 0 : i32
    return %c0_i32, %arg0 : i32, i32
  }
  func.func @transform_2(%arg0: i32) -> (i32, i32, i32) {
    %c0_i32 = arith.constant 0 : i32
    %c0_i32_0 = arith.constant 0 : i32
    %c0_i32_1 = arith.constant 0 : i32
    return %arg0, %c0_i32, %c0_i32_0 : i32, i32, i32
  }
}

</mosaic_0001>

<bundles_post_ra>
// kernel: tpu_custom_call.1
= control target key start
LH: loop header
LB: loop body
LE: loop exit
PB: predicated region body
PF: predicated region fallthrough
CT: control target
= control target key end

     0   :  { %7 = vsyncpa [#allocation3], 0  ;;  %s653_s0 = inlined_call_operand.hbm [shape: f32[3,256], index: 0, kind: input, shape index: {}]   ;;  %s654_s1 = inlined_call_operand.vmem [shape: s32[1,256], index: 1, kind: input, shape index: {}]   ;;  %s655_s2 = inlined_call_operand.hbm [shape: f32[2,1,128], index: 2, kind: output, shape index: {}]  }
   0x1   :  { %9 = vsyncpa [#allocation3 + $0x1], 0 }
   0x2   :  { %10 = vsyncpa [#allocation4], 0 }
   0x3   :  { %12 = vsyncpa [#allocation4 + $0x1], 0  ;;  %s485_s9 = smov 0   ;;  %s487_s10 = smov 0  }
   0x4   :  { %s489_s11 = smov 0   ;;  %s491_s12 = smov 0  }
   0x5 LB: > { %s506_s13 = sadd.s32 4294967295, %s466_s12   ;;  %s303_s14 = sadd.s32 4294967294, %s466_s12   ;;  %s466_s12 = sphi %s491_s12, %s670_s12   ;;  %s462_s11 = sphi %s489_s11, %s669_s11   ;;  %s458_s10 = sphi %s487_s10, %s668_s10   ;;  %s454_s9 = sphi %s485_s9, %s667_s9  }
   0x6   : > { %s510_s15 = sadd.s32 1, %s466_s12   ;;  %s25_s16 = sadd.s32 1, %s462_s11 }
   0x7   : > { %s22_s17 = ssub.s32 %s466_s12, %s510_s15  ;;  %p32_p0 = scmp.ne.s32.totalorder %s462_s11, %s458_s10 }
   0x8   : > { %p23_p1 = scmp.eq.s32.totalorder %s22_s17, 0  ;;  %p33_p2 = scmp.eq.s32.totalorder %s466_s12, 0 }
   0x9   : > { %p38_p3 = scmp.ne.s32.totalorder %s458_s10, %s454_s9  ;;  %p39_p4 = scmp.eq.s32.totalorder %s506_s13, 0 }
   0xa   : > { %s522_s18 = scalar_select %p23_p1, %s462_s11, %s25_s16  }
   0xb   : > { %p524_p5 = por %p33_p2, %p32_p0  ;;  %p528_p6 = por %p39_p4, %p38_p3 }
   0xc   : > { %p88_p7 = scmp.eq.s32.totalorder %s506_s13, 1  ;;  %p94_p8 = scmp.eq.s32.totalorder %s303_s14, 1 }
   0xd   : > { %p326_p10 = scmp.lt.s32.totalorder %s466_s12, 2  ;;  %s114_s23 = sand.u32 1, %s462_s11  }
   0xe   : > { %p535_p11 = por %p88_p7, %p32_p0  ;;  %p539_p12 = por %p94_p8, %p38_p3 }
   0xf   : > { %s307_s24 = sshll.u32 %s466_s12, 6  ;;  %s306_s25 = sshll.u32 %s114_s23, 2 }
  0x10   : > { %s659_s21 = scalar_select %p535_p11, 1, 0 }
  0x11   : > { %s660_s22 = scalar_select %p539_p12, 1, 0 }
  0x12   : > { %s548_s28 = scalar_lea.hbm %s653_s0, %s307_s24  ;;  %s118_s29 = scalar_lea.vmem [#allocation2], %s306_s25 }
  0x13   : > { %s125_s30 = sshll.u32 %s118_s29, 4  ;;  %p552_p13 = pnand %p326_p10, %p524_p5  ;;  %s556_s30 = int_to_ptr.vmem [resolvable:$true] %s125_s30 }
  0x14   : > { %s115_s4 = scalar_lea.sflag [#allocation3], %s114_s23  ;;  %s370_s5 = scalar_lea.hbm %s548_s28, 64 }
  0x15   : > { %p371_p2 = scmp.ne.s32.totalorder %s548_s28, %s370_s5  ;;  %p372_p3 = pneg %p552_p13 }
  0x16   : > { %s375_s8 = scalar_lea.hbm %s653_s0, 128  ;;  %p376_p5 = scmp.lt.u32.totalorder %s548_s28, %s653_s0 }
  0x17   : > { %p373_p4 = pnand %p372_p3, %p371_p2  ;;  %p377_p8 = scmp.lt.u32.totalorder %s375_s8, %s370_s5 }
  0x18   : > { %p379_p9 = scmp.lt.u32.totalorder %s370_s5, %s548_s28 }
  0x19   : > { %p374_p7 = pneg %p373_p4  ;;  %p378_p10 = por %p377_p8, %p376_p5 }
  0x1b   : > { %p380_p0 = por %p379_p9, %p378_p10 }
  0x1d   : > { %p381_p1 = pnand %p380_p0, %p374_p7 }
  0x1f   : > { %384 = shalt.err (!%p381_p1)
}
  0x20   : > { %s385_s17 = scalar_lea.vmem %s556_s30, 64  ;;  %s468_s19 = smov [#allocation2]  }
  0x21   : > { %p386_p2 = scmp.ne.s32.totalorder %s556_s30, %s385_s17  ;;  %s390_s23 = sshll.u32 %s468_s19, 4  ;;  %s391_s23 = int_to_ptr.vmem [resolvable:$false] %s390_s23 }
  0x22   : > { %s392_s24 = scalar_lea.vmem %s391_s23, 128  ;;  %p393_p11 = scmp.lt.s32.totalorder %s556_s30, %s391_s23 }
  0x23   : > { %p388_p4 = pnand %p386_p2, %p372_p3  ;;  %p394_p5 = scmp.lt.s32.totalorder %s392_s24, %s385_s17 }
  0x25   : > { %p389_p12 = pneg %p388_p4  ;;  %p395_p8 = por %p394_p5, %p393_p11 }
  0x27   : > { %p396_p9 = pnand %p395_p8, %p389_p12 }
  0x29   : > { %399 = shalt.err (!%p396_p9)
}
  0x2a   : > { %321 = dma.hbm_to_vmem [thread:$0]  (!%p552_p13), %s548_s28, 64, %s556_s30, %s115_s4  }
  0x2b   : > { %p662_p0 = scmp.lt.s32.totalorder %s466_s12, 3  ;;  %p663_p1 = scmp.ge.s32.totalorder %s466_s12, 1 }
  0x2d   : > { %p137_p3 = pnand %p663_p1, %p662_p0 }
  0x2e   : > { %s590_s25 = sand.u32 (!%p137_p3), 1, %s458_s10  }
  0x2f   : > { %140 = sbr.rel (%p137_p3) target bundleno = 274 (0x112), region = 28  ;;  %s309_s26 = sshll.u32 (!%p137_p3), %s590_s25, 2 }
  0x30   : > { %s143_s27 = scalar_lea.sflag (!%p137_p3), [#allocation3], %s590_s25  ;;  %s146_s29 = scalar_lea.vmem (!%p137_p3), [#allocation2], %s309_s26 }
  0x36   : > { %445 = dma.done.wait (%p528_p6), %s143_s27, 64  }
  0x37   : > { %447 = vsyncadd (%p528_p6), %s143_s27, 4294967232  ;;  %v172_v0 = vld [vmem:[%s146_s29] sm:$0x1]  ;;  %v173_v1 = vld [vmem:[%s146_s29 + $0x1] sm:$0x1]  ;;  %p169_p11 = scmp.lt.s32.totalorder %s506_s13, 1  ;;  %v204_v24 = vlaneseq }
  0x38   : > { %v174_v2 = vld [vmem:[%s146_s29 + $0x2] sm:$0x1]  ;;  %v175_v3 = vmax.f32 %v172_v0, %v173_v1  ;;  %s310_s4 = sshll.u32 %s506_s13, 7  ;;  %vm210_vm3 = vcmask 1040384   ;;  %s168_s5 = scalar_lea.vmem [#allocation5], %s590_s25 }
  0x39   : > { %s170_s20 = scalar_select %p169_p11, %s506_s13, 1  ;;  %v205_v25 = vand.u32 127, %v204_v24  ;;  %v206_v26 = vstv %s310_s4 }
  0x3a   : > { %v176_v4 = vmax.f32 %v175_v3, %v174_v2  ;;  %s228_s6 = sshll.u32 %s168_s5, 4  ;;  %s311_s7 = sshll.u32 %s506_s13, 4  ;;  %s606_s6 = int_to_ptr.vmem [resolvable:$true] %s228_s6 }
  0x3b   : > { %s171_s3 = scalar_lea.vmem %s654_s1, %s170_s20  ;;  %v207_v28 = vadd.s32 %v206_v26, %v205_v25  ;;  %s611_s16 = scalar_lea.hbm %s655_s2, %s311_s7 }
  0x3c   : > { %v177_v5 = vsub.f32 %v172_v0, %v176_v4  ;;  %v180_v6 = vsub.f32 %v173_v1, %v176_v4  ;;  %v184_v7 = vsub.f32 %v174_v2, %v176_v4  ;;  %v191_v16 = vld [vmem:[%s171_s3] sm:$0x1]  ;;  %s216_s17 = scalar_lea.sflag [#allocation4], %s590_s25  ;;  %s400_s19 = scalar_lea.vmem %s606_s6, 16 }
  0x3d   : > { %vm192_vm0 = vcmp.eq.s32.totalorder %v191_v16, 1  ;;  %vm194_vm1 = vcmp.eq.s32.totalorder %v191_v16, 0  ;;  %vm208_vm2 = vcmp.lt.s32.totalorder %v207_v28, 256  ;;  %p401_p6 = scmp.ne.s32.totalorder %s606_s6, %s400_s19  ;;  %p664_p12 = scmp.ne.s32.totalorder %s659_s21, 0 }
  0x3e   : > { %v178_v8 = vmul.f32 1.442695, %v177_v5  ;;  %v181_v9 = vmul.f32 1.442695, %v180_v6  ;;  %v185_v10 = vmul.f32 1.442695, %v184_v7  ;;  %v193_v17 = vsel %vm192_vm0, %v173_v1, %v174_v2 }
  0x3f   : > { %v195_v20 = vsel %vm194_vm1, %v172_v0, %v193_v17  ;;  %p402_p13 = pnand %p401_p6, %p664_p12  ;;  %s469_s23 = smov [#allocation5]  }
  0x40   : > { %360 = vpow2.f32 %v178_v8  ;;  %s404_s13 = sshll.u32 %s469_s23, 4  ;;  %s405_s13 = int_to_ptr.vmem [resolvable:$false] %s404_s13 }
  0x41   : > { %362 = vpow2.f32 %v181_v9  ;;  %p403_p7 = pneg %p402_p13  ;;  %s406_s24 = scalar_lea.vmem %s405_s13, 32 }
  0x42   : > { %364 = vpow2.f32 %v185_v10  ;;  %p407_p10 = scmp.lt.s32.totalorder %s606_s6, %s405_s13  ;;  %p408_p2 = scmp.lt.s32.totalorder %s406_s24, %s400_s19 }
  0x44   : > { %p409_p4 = por %p408_p2, %p407_p10 }
  0x46   : > { %p410_p5 = pnand %p409_p4, %p403_p7 }
  0x4a   : > { %v361_v11 = vpop.eup %360 }
  0x4b   : > { %v363_v12 = vpop.eup %362 }
  0x4c   : > { %v365_v13 = vpop.eup %364  ;;  %v183_v14 = vadd.f32 %v363_v12, %v361_v11 }
  0x4e   : > { %v187_v15 = vadd.f32 %v365_v13, %v183_v14 }
  0x50   : > { %366 = vlog2.f32 %v187_v15 }
  0x5a   : > { %v367_v18 = vpop.eup %366 }
  0x5b   : > { %v189_v19 = vmul.f32 0.6931472, %v367_v18 }
  0x5d   : > { %v190_v21 = vadd.f32 %v189_v19, %v176_v4 }
  0x5f   : > { %v196_v22 = vsub.f32 %v195_v20, %v190_v21 }
  0x61   : > { %v197_v23 = vmul.f32 1.442695, %v196_v22  ;;  %v199_v29 = vsub.f32 0.0, %v196_v22 }
  0x63   : > { %368 = vpow2.f32 %v197_v23 }
  0x6d   : > { %v369_v27 = vpop.eup %368 }
  0x6e   : > { %v200_v30 = vsub.f32 1.0, %v369_v27 }
  0x70   : > { %v201_v31 = vmul.f32 %v200_v30, %v200_v30 }
  0x72   : > { %v202_v32 = vmul.f32 %v201_v31, %v199_v29 }
  0x74   : > { %v209_v33 = vsel %vm208_vm2, %v202_v32, 0.0 }
  0x75   : > { %v211_v34 = vsel %vm210_vm3, %v209_v33, 0.0 }
  0x76   : > { %212 = vadd.xlane.f32.xlu0 %v211_v34 }
 0x103   : > { %v213_v35 = vpop.xlane.xlu0 %212 }
 0x104   : > { %214 = vst [vmem:[%s168_s5] sm:$0x1] %v213_v35 }
 0x105   : > { %413 = shalt.err (!%p410_p5)
}
 0x106   : > { %s414_s25 = scalar_lea.hbm %s611_s16, 16  ;;  %s418_s29 = scalar_lea.hbm %s655_s2, 32 }
 0x107   : > { %p415_p8 = scmp.ne.s32.totalorder %s611_s16, %s414_s25  ;;  %p419_p1 = scmp.lt.u32.totalorder %s611_s16, %s655_s2 }
 0x108   : > { %p420_p3 = scmp.lt.u32.totalorder %s418_s29, %s414_s25  ;;  %p422_p6 = scmp.lt.u32.totalorder %s414_s25, %s611_s16 }
 0x109   : > { %p416_p9 = pnand %p415_p8, %p664_p12 }
 0x10a   : > { %p421_p11 = por %p420_p3, %p419_p1 }
 0x10b   : > { %p417_p0 = pneg %p416_p9 }
 0x10c   : > { %p423_p13 = por %p422_p6, %p421_p11 }
 0x10e   : > { %p424_p7 = pnand %p423_p13, %p417_p0 }
 0x110   : > { %427 = shalt.err (!%p424_p7)
}
 0x111   : > { %316 = dma.vmem_to_hbm [thread:$0]  (%p664_p12), %s606_s6, 16, %s611_s16, %s216_s17  }
 0x112 PF: > { %s240_s30 = sand.u32 1, %s454_s9   ;;  %p665_p10 = scmp.ne.s32.totalorder %s660_s22, 0 }
 0x113   : > { %p666_p2 = scmp.ge.s32.totalorder %s466_s12, 2  ;;  %s241_s3 = scalar_lea.sflag [#allocation4], %s240_s30 }
 0x115   : > { %p323_p4 = pnand %p666_p2, %p665_p10 }
 0x117   : > { %449 = dma.done.wait (!%p323_p4), %s241_s3, 16  }
 0x118   : > { %451 = vsyncadd (!%p323_p4), %s241_s3, 4294967280  ;;  %p15_p5 = scmp.ge.s32.totalorder %s510_s15, 4   ;;  %s667_s9 = smov %s458_s10 }
 0x119   : > { %s668_s10 = smov %s462_s11  ;;  %s669_s11 = smov %s522_s18 }
 0x11a   : > { %s670_s12 = smov %s510_s15  ;;  %17 = sbr.rel (!%p15_p5) target bundleno = 5 (0x5), region = 76 }
 0x121   :  { %245 = vsyncpa [#allocation3], 1 }
 0x122   :  { %247 = vsyncpa [#allocation3 + $0x1], 1 }
 0x123   :  { %248 = vsyncpa [#allocation4], 1 }
 0x124   :  { %250 = vsyncpa [#allocation4 + $0x1], 1 }

</bundles_post_ra>
